<compile_context>
chip_gen: v7x
topology: tpu7x:2x2x1
jax: 0.10.0
libtpu: 0.0.40
codegen_flags: <defaults>
</compile_context>

<pallas_src>
import functools
import math

import jax
import jax.numpy as jnp
from jax.experimental import pallas as pl
from jax.experimental.pallas import tpu as pltpu


def _round_up(x, m):
    return ((x + m - 1) // m) * m


def _attn_kernel(x1_ref, x2_ref, o_ref, *, scale):
    # x1_ref: (1, TM, K) query rows; x2_ref: (1, Nkv, K) keys; o_ref: (1, TM, Nkv)
    q = x1_ref[0]
    k = x2_ref[0]
    # q @ k^T with f32 accumulation on the MXU (no f32 up-cast of the inputs).
    dots = jax.lax.dot_general(
        q, k,
        dimension_numbers=(((1,), (1,)), ((), ())),
        preferred_element_type=jnp.float32,
    ) * scale
    # Numerically-stable softmax over the last dim, all stats in f32.
    m = jnp.max(dots, axis=-1, keepdims=True)
    e = jnp.exp(dots - m)
    denom = jnp.sum(e, axis=-1, keepdims=True)
    o_ref[0] = (e / denom).astype(o_ref.dtype)


def _matmul_kernel(x1_ref, x2_ref, o_ref):
    # x1_ref: (1, TM, K); x2_ref: (1, K, N); o_ref: (1, TM, N)
    o_ref[0] = jnp.dot(
        x1_ref[0], x2_ref[0], preferred_element_type=jnp.float32
    ).astype(o_ref.dtype)


def scaled_dot_prod(x1, x2, scale=None, is_attn=False, row_tile=512):
    """Pallas implementation of ScaledDotProd.forward.

    is_attn=True : x1 (..., M, K), x2 (..., Nkv, K) -> softmax(x1 @ x2^T * scale)
    is_attn=False: x1 (..., M, K), x2 (..., K, N)   -> x1 @ x2
    """
    batch_shape = x1.shape[:-2]
    M, K = x1.shape[-2:]
    G = math.prod(batch_shape) if batch_shape else 1
    x1_3 = x1.reshape(G, M, K)
    x2_3 = x2.reshape(G, *x2.shape[-2:])

    if is_attn:
        assert scale is not None, "scale (dim_head) must be set when is_attn=True"
        n_kv, k2 = x2_3.shape[-2:]
        assert k2 == K, "contraction dims must match"
        n_out = n_kv
        kernel = functools.partial(_attn_kernel, scale=float(scale))
        # Keys are constant across the row-tile axis; block index only moves with g.
        x2_spec = pl.BlockSpec((1, n_kv, K), lambda g, i: (g, 0, 0))
    else:
        k2, n_out = x2_3.shape[-2:]
        assert k2 == K, "contraction dims must match"
        kernel = _matmul_kernel
        x2_spec = pl.BlockSpec((1, K, n_out), lambda g, i: (g, 0, 0))

    # Row tiling: TM is a multiple of 8; pad M up so no rows are dropped.
    # (sweep row_tile in 256..1024 for large problems)
    TM = min(row_tile, _round_up(M, 8))
    M_pad = _round_up(M, TM)
    if M_pad != M:
        x1_3 = jnp.pad(x1_3, ((0, 0), (0, M_pad - M), (0, 0)))

    out = pl.pallas_call(
        kernel,
        out_shape=jax.ShapeDtypeStruct((G, M_pad, n_out), x1.dtype),
        grid_spec=pltpu.PrefetchScalarGridSpec(
            num_scalar_prefetch=0,
            grid=(G, M_pad // TM),
            in_specs=[
                pl.BlockSpec((1, TM, K), lambda g, i: (g, i, 0)),  # x1 row tile
                x2_spec,                                           # full x2 per group
            ],
            out_specs=pl.BlockSpec((1, TM, n_out), lambda g, i: (g, i, 0)),
        ),
        compiler_params=pltpu.CompilerParams(
            dimension_semantics=("parallel", "parallel"),
            vmem_limit_bytes=64 * 1024 * 1024,
        ),
    )(x1_3, x2_3)

    out = out[:, :M, :]
    return out.reshape(*batch_shape, M, n_out)


# ------------------------------ reference ----------------------------------
def scaled_dot_prod_ref(x1, x2, scale=None, is_attn=False):
    if is_attn:
        dots = jnp.einsum("...nd,...md->...nm", x1, x2) * scale
        return jax.nn.softmax(dots, axis=-1)
    return jnp.einsum("...nk,...km->...nm", x1, x2)


if __name__ == "__main__":
    key = jax.random.PRNGKey(0)
    B, H, N, D = 2, 4, 8, 32
    k1, k2, k3 = jax.random.split(key, 3)

    q = jax.random.normal(k1, (B, H, N, D), dtype=jnp.float32)
    k = jax.random.normal(k2, (B, H, N, D), dtype=jnp.float32)
    v = jax.random.normal(k3, (B, H, N, D), dtype=jnp.float32)
    scale = D ** -0.5  # what the ViT passes as dim_head to ScaledDotProd

    # is_attn=True branch: attention weights
    attn = scaled_dot_prod(q, k, scale=scale, is_attn=True)
    jax.block_until_ready(attn)
    attn_ref = scaled_dot_prod_ref(q, k, scale=scale, is_attn=True)
    assert attn.shape == (B, H, N, N)
    assert jnp.allclose(attn, attn_ref, atol=2e-3, rtol=2e-3), "attn mismatch"

    # is_attn=False branch: plain matmul (attn @ v)
    out = scaled_dot_prod(attn, v, is_attn=False)
    jax.block_until_ready(out)
    out_ref = scaled_dot_prod_ref(attn_ref, v, is_attn=False)
    assert out.shape == (B, H, N, D)
    assert jnp.allclose(out, out_ref, atol=2e-3, rtol=2e-3), "matmul mismatch"

    print("KERNEL_OK")
</pallas_src>

<mosaic_0001>
module attributes {stable_mosaic.version = 11 : i64} {
  func.func @_attn_kernel(%arg0: i32, %arg1: i32, %arg2: memref<1x8x32xf32, #tpu.memory_space<vmem>>, %arg3: memref<1x8x32xf32, #tpu.memory_space<vmem>>, %arg4: memref<1x8x8xf32, #tpu.memory_space<vmem>>) attributes {dimension_semantics = [#tpu.dimension_semantics<parallel>, #tpu.dimension_semantics<parallel>], iteration_bounds = array<i64: 8, 1>, scalar_prefetch = 0 : i64, scratch_operands = 0 : i64, tpu.core_type = #tpu.core_type<tc>, window_params = [{transform_indices = @transform_0, window_bounds = array<i64: 1, 8, 32>}, {transform_indices = @transform_1, window_bounds = array<i64: 1, 8, 32>}, {transform_indices = @transform_2, window_bounds = array<i64: 1, 8, 8>}]} {
    %c0 = arith.constant 0 : index
    %c0_0 = arith.constant 0 : index
    %c0_1 = arith.constant 0 : index
    %0 = vector.load %arg2[%c0, %c0_0, %c0_1] : memref<1x8x32xf32, #tpu.memory_space<vmem>>, vector<1x8x32xf32>
    %1 = vector.shape_cast %0 : vector<1x8x32xf32> to vector<8x32xf32>
    %c0_2 = arith.constant 0 : index
    %c0_3 = arith.constant 0 : index
    %c0_4 = arith.constant 0 : index
    %2 = vector.load %arg3[%c0_2, %c0_3, %c0_4] : memref<1x8x32xf32, #tpu.memory_space<vmem>>, vector<1x8x32xf32>
    %3 = vector.shape_cast %2 : vector<1x8x32xf32> to vector<8x32xf32>
    %cst = arith.constant dense<0.000000e+00> : vector<8x8xf32>
    %4 = tpu.matmul %1, %3, %cst {dimension_numbers = #tpu.dot_dimension_numbers<[1], [1], [0], [0], [0, 0, 1, 0], [], []>} : vector<8x32xf32>, vector<8x32xf32>, vector<8x8xf32> -> vector<8x8xf32>
    %cst_5 = arith.constant 0.176776692 : f32
    %5 = vector.broadcast %cst_5 : f32 to vector<8x8xf32>
    %6 = arith.mulf %4, %5 : vector<8x8xf32>
    %cst_6 = arith.constant dense<0xFF800000> : vector<8xf32>
    %7 = vector.multi_reduction <maximumf>, %6, %cst_6 [1] : vector<8x8xf32> to vector<8xf32>
    %8 = vector.shape_cast %7 : vector<8xf32> to vector<8x1xf32>
    %9 = vector.broadcast %8 : vector<8x1xf32> to vector<8x8xf32>
    %10 = arith.subf %6, %9 : vector<8x8xf32>
    %11 = math.exp %10 : vector<8x8xf32>
    %cst_7 = arith.constant dense<0.000000e+00> : vector<8xf32>
    %12 = vector.multi_reduction <add>, %11, %cst_7 [1] : vector<8x8xf32> to vector<8xf32>
    %13 = vector.shape_cast %12 : vector<8xf32> to vector<8x1xf32>
    %14 = vector.broadcast %13 : vector<8x1xf32> to vector<8x8xf32>
    %15 = arith.divf %11, %14 : vector<8x8xf32>
    %c0_8 = arith.constant 0 : index
    %c0_9 = arith.constant 0 : index
    %c0_10 = arith.constant 0 : index
    %16 = vector.load %arg4[%c0_8, %c0_9, %c0_10] : memref<1x8x8xf32, #tpu.memory_space<vmem>>, vector<1x8x8xf32>
    %17 = vector.shape_cast %16 : vector<1x8x8xf32> to vector<8x8xf32>
    %18 = vector.shape_cast %15 : vector<8x8xf32> to vector<1x8x8xf32>
    tpu.vector_store %arg4[%c0_8, %c0_9, %c0_10], %18 {strides = array<i32>} : memref<1x8x8xf32, #tpu.memory_space<vmem>>, vector<1x8x8xf32>,
    return
  }
  func.func @transform_0(%arg0: i32, %arg1: i32) -> (i32, i32, i32) {
    %c0_i32 = arith.constant 0 : i32
    %c0_i32_0 = arith.constant 0 : i32
    return %arg0, %arg1, %c0_i32 : i32, i32, i32
  }
  func.func @transform_1(%arg0: i32, %arg1: i32) -> (i32, i32, i32) {
    %c0_i32 = arith.constant 0 : i32
    %c0_i32_0 = arith.constant 0 : i32
    %c0_i32_1 = arith.constant 0 : i32
    return %arg0, %c0_i32, %c0_i32_0 : i32, i32, i32
  }
  func.func @transform_2(%arg0: i32, %arg1: i32) -> (i32, i32, i32) {
    %c0_i32 = arith.constant 0 : i32
    %c0_i32_0 = arith.constant 0 : i32
    return %arg0, %arg1, %c0_i32 : i32, i32, i32
  }
}

</mosaic_0001>

<bundles_post_ra>
// kernel: tpu_custom_call.1
= control target key start
LH: loop header
LB: loop body
LE: loop exit
PB: predicated region body
PF: predicated region fallthrough
CT: control target
= control target key end

     0   :  { %7 = vsyncpa [#allocation3], 0  ;;  %s916_s0 = inlined_call_operand.hbm [shape: f32[8,8,32], index: 0, kind: input, shape index: {}]   ;;  %s917_s1 = inlined_call_operand.hbm [shape: f32[8,8,32], index: 1, kind: input, shape index: {}]   ;;  %s918_s2 = inlined_call_operand.hbm [shape: f32[8,8,8], index: 2, kind: output, shape index: {}]  }
   0x1   :  { %9 = vsyncpa [#allocation3 + $0x1], 0 }
   0x2   :  { %10 = vsyncpa [#allocation6], 0 }
   0x3   :  { %12 = vsyncpa [#allocation6 + $0x1], 0 }
   0x4   :  { %13 = vsyncpa [#allocation4], 0 }
   0x5   :  { %15 = vsyncpa [#allocation4 + $0x1], 0  ;;  %s690_s9 = smov 0   ;;  %s692_s10 = smov 0  }
   0x6   :  { %s694_s11 = smov 0   ;;  %s696_s12 = smov 0  }
   0x7   :  { %s698_s13 = smov 0   ;;  %s700_s14 = smov 0  }
   0x8 LB: > { %s424_s15 = sadd.s32 4294967295, %s668_s14   ;;  %s425_s16 = sadd.s32 4294967294, %s668_s14   ;;  %s668_s14 = sphi %s700_s14, %s21_s14   ;;  %s664_s13 = sphi %s698_s13, %s937_s13   ;;  %s660_s12 = sphi %s696_s12, %s936_s12   ;;  %s656_s11 = sphi %s694_s11, %s935_s11   ;;  %s652_s10 = sphi %s692_s10, %s934_s10   ;;  %s648_s9 = sphi %s690_s9, %s933_s9  }
   0x9   : > { %s33_s17 = sadd.s32 1, %s664_s13  ;;  %s42_s18 = sadd.s32 1, %s656_s11 }
   0xa   : > { %p35_p0 = scmp.ge.s32.totalorder %s33_s17, 8  ;;  %p49_p1 = scmp.ne.s32.totalorder %s656_s11, %s652_s10 }
   0xb   : > { %p50_p2 = scmp.eq.s32.totalorder %s668_s14, 0  ;;  %p55_p3 = scmp.ne.s32.totalorder %s652_s10, %s648_s9 }
   0xc   : > { %s939_s17 = smov (%p35_p0, %s33_s17), 0  ;;  %p56_p5 = scmp.eq.s32.totalorder %s424_s15, 0 }
   0xd   : > { %p731_p4 = por %p50_p2, %p49_p1  ;;  %s37_s20 = ssub.s32 %s664_s13, %s939_s17 }
   0xe   : > { %p107_p6 = scmp.eq.s32.totalorder %s424_s15, 7  ;;  %p40_p7 = scmp.eq.s32.totalorder %s37_s20, 0 }
   0xf   : > { %p737_p8 = por %p56_p5, %p55_p3  ;;  %p113_p10 = scmp.eq.s32.totalorder %s425_s16, 7 }
  0x10   : > { %p741_p9 = por %p107_p6, %p49_p1  ;;  %p466_p12 = scmp.lt.s32.totalorder %s668_s14, 8 }
  0x11   : > { %s922_s21 = scalar_select %p737_p8, 1, 0 }
  0x12   : > { %s923_s22 = scalar_select %p741_p9, 1, 0 }
  0x13   : > { %s746_s23 = scalar_select %p40_p7, %s656_s11, %s42_s18  }
  0x14   : > { %p748_p11 = por %p113_p10, %p55_p3  ;;  %s754_s25 = sand.u32 1, %s656_s11  }
  0x15   : > { %s428_s26 = sshll.u32 %s754_s25, 3  ;;  %s429_s27 = sshll.u32 %s664_s13, 7 }
  0x16   : > { %s924_s24 = scalar_select %p748_p11, 1, 0 }
  0x17   : > { %s763_s30 = scalar_lea.hbm %s916_s0, %s429_s27  ;;  %s137_s3 = scalar_lea.vmem [#allocation2], %s428_s26 }
  0x18   : > { %s145_s4 = sshll.u32 %s137_s3, 4  ;;  %p771_p13 = pnand %p466_p12, %p731_p4  ;;  %s767_s4 = int_to_ptr.vmem [resolvable:$true] %s145_s4 }
  0x19   : > { %s134_s6 = scalar_lea.sflag [#allocation3], %s754_s25  ;;  %s522_s7 = scalar_lea.hbm %s763_s30, 128 }
  0x1a   : > { %p523_p2 = scmp.ne.s32.totalorder %s763_s30, %s522_s7  ;;  %p524_p3 = pneg %p771_p13 }
  0x1b   : > { %s527_s16 = scalar_lea.hbm %s916_s0, 1024  ;;  %p528_p4 = scmp.lt.u32.totalorder %s763_s30, %s916_s0 }
  0x1c   : > { %p525_p5 = pnand %p524_p3, %p523_p2  ;;  %p529_p7 = scmp.lt.u32.totalorder %s527_s16, %s522_s7 }
  0x1d   : > { %p531_p12 = scmp.lt.u32.totalorder %s522_s7, %s763_s30 }
  0x1e   : > { %p526_p6 = pneg %p525_p5  ;;  %p530_p10 = por %p529_p7, %p528_p4 }
  0x20   : > { %p532_p0 = por %p531_p12, %p530_p10 }
  0x22   : > { %p533_p1 = pnand %p532_p0, %p526_p6 }
  0x24   : > { %536 = shalt.err (!%p533_p1)
}
  0x25   : > { %s537_s20 = scalar_lea.vmem %s767_s4, 128  ;;  %s670_s28 = smov [#allocation2]  }
  0x26   : > { %p538_p2 = scmp.ne.s32.totalorder %s767_s4, %s537_s20  ;;  %s542_s29 = sshll.u32 %s670_s28, 4  ;;  %s543_s29 = int_to_ptr.vmem [resolvable:$false] %s542_s29 }
  0x27   : > { %s544_s3 = scalar_lea.vmem %s543_s29, 256  ;;  %p545_p9 = scmp.lt.s32.totalorder %s767_s4, %s543_s29 }
  0x28   : > { %p540_p5 = pnand %p538_p2, %p524_p3  ;;  %p546_p4 = scmp.lt.s32.totalorder %s544_s3, %s537_s20 }
  0x2a   : > { %p541_p11 = pneg %p540_p5  ;;  %p547_p7 = por %p546_p4, %p545_p9 }
  0x2c   : > { %p548_p10 = pnand %p547_p7, %p541_p11 }
  0x2e   : > { %551 = shalt.err (!%p548_p10)
}
  0x2f   : > { %458 = dma.hbm_to_vmem [thread:$0]  (!%p771_p13), %s763_s30, 128, %s767_s4, %s134_s6  }
  0x30   : > { %p926_p0 = scmp.lt.s32.totalorder %s668_s14, 9  ;;  %p927_p1 = scmp.ge.s32.totalorder %s668_s14, 1 }
  0x31   : > { %s816_s16 = scalar_lea.hbm %s917_s1, %s429_s27  ;;  %s156_s18 = scalar_lea.vmem [#allocation5], %s428_s26 }
  0x32   : > { %p807_p6 = pnand %p927_p1, %p926_p0  ;;  %s163_s19 = sshll.u32 %s156_s18, 4  ;;  %s164_s19 = int_to_ptr.vmem [resolvable:$true] %s163_s19 }
  0x33   : > { %s153_s30 = scalar_lea.sflag [#allocation6], %s754_s25  ;;  %s552_s4 = scalar_lea.hbm %s816_s16, 128 }
  0x34   : > { %s928_s7 = scalar_select %p807_p6, 1, 0 }
  0x35   : > { %p553_p9 = scmp.ne.s32.totalorder %s816_s16, %s552_s4  ;;  %s557_s27 = scalar_lea.hbm %s917_s1, 1024 }
  0x36   : > { %p558_p2 = scmp.lt.u32.totalorder %s816_s16, %s917_s1  ;;  %p559_p5 = scmp.lt.u32.totalorder %s557_s27, %s552_s4 }
  0x37   : > { %p555_p11 = pnand %p553_p9, %p524_p3  ;;  %p561_p7 = scmp.lt.u32.totalorder %s552_s4, %s816_s16 }
  0x38   : > { %p560_p4 = por %p559_p5, %p558_p2 }
  0x39   : > { %p556_p12 = pneg %p555_p11 }
  0x3a   : > { %p562_p10 = por %p561_p7, %p560_p4 }
  0x3c   : > { %p563_p0 = pnand %p562_p10, %p556_p12 }
  0x3e   : > { %566 = shalt.err (!%p563_p0)
}
  0x3f   : > { %s567_s25 = scalar_lea.vmem %s164_s19, 128  ;;  %s671_s26 = smov [#allocation5]  }
  0x40   : > { %p568_p1 = scmp.ne.s32.totalorder %s164_s19, %s567_s25  ;;  %s572_s3 = sshll.u32 %s671_s26, 4  ;;  %s573_s3 = int_to_ptr.vmem [resolvable:$false] %s572_s3 }
  0x41   : > { %s574_s8 = scalar_lea.vmem %s573_s3, 256  ;;  %p575_p8 = scmp.lt.s32.totalorder %s164_s19, %s573_s3 }
  0x42   : > { %p570_p9 = pnand %p568_p1, %p524_p3  ;;  %p576_p6 = scmp.lt.s32.totalorder %s574_s8, %s567_s25 }
  0x44   : > { %p571_p11 = pneg %p570_p9  ;;  %p577_p2 = por %p576_p6, %p575_p8 }
  0x46   : > { %p578_p5 = pnand %p577_p2, %p571_p11 }
  0x48   : > { %581 = shalt.err (!%p578_p5)
}
  0x49   : > { %461 = dma.hbm_to_vmem [thread:$0]  (!%p771_p13), %s816_s16, 128, %s164_s19, %s153_s30  }
  0x4a   : > { %p929_p12 = scmp.ne.s32.totalorder %s928_s7, 0 }
  0x4b   : > { %s843_s15 = sand.u32 (!%p929_p12), 1, %s652_s10   ;;  %p930_p8 = scmp.ne.s32.totalorder (!%p929_p12), %s922_s21, 0 }
  0x4c   : > { %172 = sbr.rel (%p929_p12) target bundleno = 633 (0x279), region = 28  ;;  %s846_s18 = sshll.u32 (!%p929_p12), %s843_s15, 3 }
  0x4d   : > { %s175_s4 = scalar_lea.sflag (!%p929_p12), [#allocation3], %s843_s15  ;;  %s178_s6 = scalar_lea.vmem (!%p929_p12), [#allocation2], %s846_s18 }
  0x53   : > { %635 = dma.done.wait (%p930_p8), %s175_s4, 128  }
  0x54   : > { %637 = vsyncadd (%p930_p8), %s175_s4, 4294967168  ;;  %s184_s5 = scalar_lea.sflag [#allocation6], %s843_s15  ;;  %s187_s7 = scalar_lea.vmem [#allocation5], %s846_s18 }
  0x55   : > { %639 = dma.done.wait (%p930_p8), %s184_s5, 128  }
  0x56   : > { %641 = vsyncadd (%p930_p8), %s184_s5, 4294967168  ;;  %v672_v0 = vmov 0.0   ;;  %vm673_vm0 = vmmov 0   ;;  %vm215_vm1 = vcmask 261120   ;;  %v214_v1 = vld [vmem:[%s187_s7] sm:$0xff]  ;;  %v213_v2 = vld [vmem:[%s178_s6] sm:$0xff] }
  0x57   : > { %444 = vmatprep.subr.mxu0 %v672_v0  ;;  %446 = vmatprep.mubr.msk.f32.mxu0 %vm673_vm0, %v672_v0  ;;  %vm293_vm2 = vcmask 64512   ;;  %s439_s21 = sshll.u32 %s660_s12, 7  ;;  %s212_s16 = scalar_lea.vmem [#allocation7], %s846_s18 }
  0x58   : > { %445 = vmatpush3.xpose.msk.msra.mxu0 %vm215_vm1, %v214_v1  ;;  %s321_s19 = sshll.u32 %s212_s16, 4  ;;  %s867_s27 = scalar_lea.hbm %s918_s2, %s439_s21  ;;  %s869_s19 = int_to_ptr.vmem [resolvable:$true] %s321_s19 }
  0x59   : > { %s307_s28 = scalar_lea.sflag [#allocation4], %s843_s15  ;;  %s582_s29 = scalar_lea.vmem %s869_s19, 128 }
  0x5a   : > { %p583_p13 = scmp.ne.s32.totalorder %s869_s19, %s582_s29  ;;  %p931_p3 = scmp.ne.s32.totalorder %s923_s22, 0 }
  0x5b   : > { %447 = vmatmul.mubr.msk.f32.vlgmr.msra.gmra.mrb[0].mxu0 %vm215_vm1, %v213_v2  ;;  %s674_s12 = smov [#allocation7]  }
  0x5c   : > { %p584_p6 = pnand %p583_p13, %p931_p3  ;;  %s586_s25 = sshll.u32 %s674_s12, 4  ;;  %s587_s25 = int_to_ptr.vmem [resolvable:$false] %s586_s25 }
  0x5d   : > { %s588_s26 = scalar_lea.vmem %s587_s25, 256  ;;  %p589_p7 = scmp.lt.s32.totalorder %s869_s19, %s587_s25 }
  0x5e   : > { %p585_p4 = pneg %p584_p6  ;;  %p590_p10 = scmp.lt.s32.totalorder %s588_s26, %s582_s29 }
  0x60   : > { %p591_p0 = por %p590_p10, %p589_p7 }
  0x62   : > { %p592_p1 = pnand %p591_p0, %p585_p4 }
 0x12e   : > { %v288_v3 = vpop.f32.mrb[0].mxu0 }
 0x12f   : > { %v292_v4 = vmul.f32 0.17677669, %v288_v3  ;;  %v448_v5 = vpop.f32.mrb[1].mxu0 }
 0x131   : > { %v294_v6 = vsel %vm293_vm2, %v292_v4, -inf }
 0x132   : > { %295 = vmax.xlane.f32.xlu0 %v294_v6 }
 0x1bf   : > { %v296_v7 = vpop.xlane.xlu0 %295 }
 0x1c0   : > { %v297_v8 = vsub.f32 %v292_v4, %v296_v7 }
 0x1c2   : > { %v298_v9 = vmul.f32 1.442695, %v297_v8 }
 0x1c4   : > { %518 = vpow2.f32 %v298_v9 }
 0x1ce   : > { %v519_v10 = vpop.eup %518 }
 0x1cf   : > { %v300_v11 = vsel %vm293_vm2, %v519_v10, 0.0 }
 0x1d0   : > { %301 = vadd.xlane.f32.xlu0 %v300_v11 }
 0x25d   : > { %v302_v12 = vpop.xlane.xlu0 %301 }
 0x25e   : > { %520 = vrcp.f32 %v302_v12 }
 0x268   : > { %v521_v13 = vpop.eup %520 }
 0x269   : > { %v304_v14 = vmul.f32 %v521_v13, %v519_v10 }
 0x26b   : > { %305 = vst.msk [vmem:[%s212_s16] sm:$0xff] %vm293_vm2, %v304_v14 }
 0x26c   : > { %595 = shalt.err (!%p592_p1)
}
 0x26d   : > { %s596_s3 = scalar_lea.hbm %s867_s27, 128  ;;  %s600_s18 = scalar_lea.hbm %s918_s2, 1024 }
 0x26e   : > { %p597_p9 = scmp.ne.s32.totalorder %s867_s27, %s596_s3  ;;  %p601_p5 = scmp.lt.u32.totalorder %s867_s27, %s918_s2 }
 0x26f   : > { %p602_p12 = scmp.lt.u32.totalorder %s600_s18, %s596_s3  ;;  %p604_p13 = scmp.lt.u32.totalorder %s596_s3, %s867_s27 }
 0x270   : > { %p598_p11 = pnand %p597_p9, %p931_p3 }
 0x271   : > { %p603_p8 = por %p602_p12, %p601_p5 }
 0x272   : > { %p599_p2 = pneg %p598_p11 }
 0x273   : > { %p605_p6 = por %p604_p13, %p603_p8 }
 0x275   : > { %p606_p4 = pnand %p605_p6, %p599_p2 }
 0x277   : > { %609 = shalt.err (!%p606_p4)
}
 0x278   : > { %453 = dma.vmem_to_hbm [thread:$0]  (%p931_p3), %s869_s19, 128, %s867_s27, %s307_s28  }
 0x279 PF: > { %p467_p7 = scmp.ge.s32.totalorder %s668_s14, 2  ;;  %s333_s5 = sand.u32 1, %s648_s9  }
 0x27a   : > { %p932_p10 = scmp.ne.s32.totalorder %s924_s24, 0  ;;  %s334_s7 = scalar_lea.sflag [#allocation4], %s333_s5 }
 0x27c   : > { %p463_p0 = pnand %p467_p7, %p932_p10 }
 0x27e   : > { %643 = dma.done.wait (!%p463_p0), %s334_s7, 128  }
 0x27f   : > { %645 = vsyncadd (!%p463_p0), %s334_s7, 4294967168  ;;  %s21_s14 = sadd.s32 1, %s668_s14   ;;  %s933_s9 = smov %s652_s10 }
 0x280   : > { %p18_p1 = scmp.ge.s32.totalorder %s21_s14, 10   ;;  %s934_s10 = smov %s656_s11 }
 0x281   : > { %s935_s11 = smov %s746_s23  ;;  %s936_s12 = smov %s664_s13 }
 0x282   : > { %s937_s13 = smov %s939_s17  ;;  %20 = sbr.rel (!%p18_p1) target bundleno = 8 (0x8), region = 86 }
 0x289   :  { %339 = vsyncpa [#allocation3], 1 }
 0x28a   :  { %341 = vsyncpa [#allocation3 + $0x1], 1 }
 0x28b   :  { %342 = vsyncpa [#allocation6], 1 }
 0x28c   :  { %344 = vsyncpa [#allocation6 + $0x1], 1 }
 0x28d   :  { %345 = vsyncpa [#allocation4], 1 }
 0x28e   :  { %347 = vsyncpa [#allocation4 + $0x1], 1 }

</bundles_post_ra>
